<compile_context>
chip_gen: v6e
topology: v6e:2x2x1
jax: 0.10.0
libtpu: 0.0.40
codegen_flags: <defaults>
</compile_context>

<pallas_src>
import functools

import jax
import jax.numpy as jnp
from jax import lax
from jax.experimental import pallas as pl
from jax.experimental.pallas import tpu as pltpu


# ---------------------------------------------------------------------------
# Generation-aware VMEM budgets & accounting
# ---------------------------------------------------------------------------
def _vmem_budgets():
    """Returns (workset_budget_bytes, vmem_limit_bytes) for this TPU generation."""
    vmem_cap = None
    try:
        info = pltpu.get_tpu_info()
        vmem_cap = getattr(info, "vmem_capacity_bytes", None)
    except Exception:
        vmem_cap = None
    if vmem_cap is None or vmem_cap <= 96 * 1024 * 1024:
        # v7x-class (64 MiB VMEM / TC) or unknown: stay conservative.
        return 24 * 1024 * 1024, 40 * 1024 * 1024
    # v5e / v6e: 128 MiB VMEM — bigger blocks are fine (returns taper past ~8 MiB).
    return 40 * 1024 * 1024, 56 * 1024 * 1024


def _per_elem_cost(itemsize):
    # in + out blocks, double-buffered, HBM dtype  -> 4 * itemsize
    # f32 in-kernel temporaries (x, xc, result)    -> ~3 * 4 bytes
    return 4 * itemsize + 12


def _sublane(itemsize):
    # sublane packing: f32 -> 8, bf16/f16 -> 16, int8/fp8 -> 32
    return 8 * (4 // itemsize)


def _round_up(x, m):
    return ((x + m - 1) // m) * m


# ---------------------------------------------------------------------------
# Tile pickers
# ---------------------------------------------------------------------------
def _pick_rows_tile(R, lane_width, itemsize, workset_bytes):
    """Row tile for a (R, lane_width) channels_last slab (lane_width = padded C)."""
    sub = _sublane(itemsize)
    per_row = lane_width * _per_elem_cost(itemsize)
    tm = max(sub, workset_bytes // per_row)
    # Never collapse the grid to a single step for non-trivial slabs.
    if R * lane_width * itemsize > 2 * 1024 * 1024:
        tm = min(tm, pl.cdiv(R, 4))
    tm = min(tm, R)
    if tm < R:
        tm = max(sub, (tm // sub) * sub)
    return int(tm)


def _pick_cf_tiles(N, C, HW, itemsize, workset_bytes):
    """(tn, thw) block sizes for the (N, C, HW) channels_first layout."""
    per_elem = _per_elem_cost(itemsize)
    per_img = C * max(HW, 128) * per_elem          # lane padding for tiny HW
    if per_img <= workset_bytes:
        # Whole (C, HW) plane fits: batch several images per block.
        tn = min(N, max(1, workset_bytes // per_img))
        thw = HW
    else:
        tn = 1
        thw = workset_bytes // (C * per_elem)
        thw = max(128, (thw // 128) * 128)
        thw = min(thw, HW)
    # Keep >= 4 pipeline steps for non-trivial inputs.
    if N * C * HW * itemsize > 2 * 1024 * 1024:
        while tn > 1 and pl.cdiv(N, tn) * pl.cdiv(HW, thw) < 4:
            tn = max(1, tn // 2)
        if pl.cdiv(N, tn) * pl.cdiv(HW, thw) < 4 and HW > 128:
            cand = max(128, (pl.cdiv(HW, 4) // 128) * 128)
            thw = min(thw, cand)
    return int(tn), int(thw)


# ---------------------------------------------------------------------------
# Kernels
# ---------------------------------------------------------------------------
def _layernorm_cl_kernel(x_ref, w_ref, b_ref, o_ref, *, eps, inv_c):
    # x_ref: (TM, C); normalize over the lane (last) axis.
    x = x_ref[...].astype(jnp.float32)
    mu = jnp.sum(x, axis=-1, keepdims=True) * inv_c
    xc = x - mu
    var = jnp.sum(xc * xc, axis=-1, keepdims=True) * inv_c   # biased (matches torch)
    inv = lax.rsqrt(var + eps)                               # EUP
    w = w_ref[...].astype(jnp.float32)                       # (1, C)
    b = b_ref[...].astype(jnp.float32)
    o_ref[...] = (xc * inv * w + b).astype(o_ref.dtype)


def _layernorm_cl_packed_kernel(x_ref, w_ref, b_ref, o_ref, *, eps, inv_c, seg_c):
    # x_ref: (TM, KC) with KC = k*seg_c = 128.  Each lane-segment of width seg_c
    # is one logical row; segment sums are done with a block-diagonal ones matmul
    # on the otherwise-idle MXU, so every load/store is full-width (no vst.msk).
    x = x_ref[...].astype(jnp.float32)
    kc = x.shape[-1]
    r = lax.broadcasted_iota(jnp.int32, (kc, kc), 0) // seg_c
    c = lax.broadcasted_iota(jnp.int32, (kc, kc), 1) // seg_c
    m = (r == c).astype(jnp.float32)                         # block-diagonal ones
    mu = jnp.dot(x, m, preferred_element_type=jnp.float32) * inv_c
    xc = x - mu
    var = jnp.dot(xc * xc, m, preferred_element_type=jnp.float32) * inv_c
    inv = lax.rsqrt(var + eps)
    w = w_ref[...].astype(jnp.float32)                       # (1, KC) = tiled weight
    b = b_ref[...].astype(jnp.float32)
    o_ref[...] = (xc * inv * w + b).astype(o_ref.dtype)


def _layernorm_cf_kernel(x_ref, w_ref, b_ref, o_ref, *, eps, inv_c):
    # x_ref: (TN, C, THW); normalize over the sublane (channel) axis — no transposes.
    x = x_ref[...].astype(jnp.float32)
    mu = jnp.sum(x, axis=1, keepdims=True) * inv_c
    xc = x - mu
    var = jnp.sum(xc * xc, axis=1, keepdims=True) * inv_c
    inv = lax.rsqrt(var + eps)
    w = w_ref[...].astype(jnp.float32)                       # (1, C, 1)
    b = b_ref[...].astype(jnp.float32)
    o_ref[...] = (xc * inv * w + b).astype(o_ref.dtype)


# ---------------------------------------------------------------------------
# Pallas wrappers
# ---------------------------------------------------------------------------
def _layer_norm_rows(x2d, weight, bias, eps):
    """LayerNorm over the last axis of a (R, C) array (channels_last)."""
    R, C = x2d.shape
    itemsize = x2d.dtype.itemsize
    workset, vmem_limit = _vmem_budgets()
    cparams_1d = lambda: pltpu.CompilerParams(
        dimension_semantics=("parallel",), vmem_limit_bytes=vmem_limit)

    # Lane-dense path for small C: pack k = 128 // C rows into one 128-lane row.
    if C < 128 and 128 % C == 0 and R % (128 // C) == 0:
        k = 128 // C
        kc = k * C
        xp = x2d.reshape(R // k, kc)                    # free, row-major reinterpret
        wp = jnp.tile(weight.reshape(1, C), (1, k))     # lane j -> weight[j % C]
        bp = jnp.tile(bias.reshape(1, C), (1, k))
        rp = R // k
        tm = _pick_rows_tile(rp, kc, itemsize, workset)
        y = pl.pallas_call(
            functools.partial(_layernorm_cl_packed_kernel,
                              eps=eps, inv_c=1.0 / C, seg_c=C),
            out_shape=jax.ShapeDtypeStruct((rp, kc), x2d.dtype),
            grid=(pl.cdiv(rp, tm),),
            in_specs=[
                pl.BlockSpec((tm, kc), lambda i: (i, 0)),
                pl.BlockSpec((1, kc), lambda i: (0, 0)),
                pl.BlockSpec((1, kc), lambda i: (0, 0)),
            ],
            out_specs=pl.BlockSpec((tm, kc), lambda i: (i, 0)),
            compiler_params=cparams_1d(),
        )(xp, wp, bp)
        return y.reshape(R, C)

    # General path (C >= 128 or non-packable C).
    lane_width = _round_up(C, 128)
    tm = _pick_rows_tile(R, lane_width, itemsize, workset)
    w2 = weight.reshape(1, C)
    b2 = bias.reshape(1, C)
    return pl.pallas_call(
        functools.partial(_layernorm_cl_kernel, eps=eps, inv_c=1.0 / C),
        out_shape=jax.ShapeDtypeStruct((R, C), x2d.dtype),
        grid=(pl.cdiv(R, tm),),
        in_specs=[
            pl.BlockSpec((tm, C), lambda i: (i, 0)),
            pl.BlockSpec((1, C), lambda i: (0, 0)),
            pl.BlockSpec((1, C), lambda i: (0, 0)),
        ],
        out_specs=pl.BlockSpec((tm, C), lambda i: (i, 0)),
        compiler_params=cparams_1d(),
    )(x2d, w2, b2)


def _layer_norm_channels_first(x3d, weight, bias, eps):
    """LayerNorm over axis 1 of a (N, C, HW) array — no transposes."""
    N, C, HW = x3d.shape
    itemsize = x3d.dtype.itemsize
    workset, vmem_limit = _vmem_budgets()
    tn, thw = _pick_cf_tiles(N, C, HW, itemsize, workset)
    w3 = weight.reshape(1, C, 1)
    b3 = bias.reshape(1, C, 1)
    return pl.pallas_call(
        functools.partial(_layernorm_cf_kernel, eps=eps, inv_c=1.0 / C),
        out_shape=jax.ShapeDtypeStruct((N, C, HW), x3d.dtype),
        grid=(pl.cdiv(N, tn), pl.cdiv(HW, thw)),
        in_specs=[
            pl.BlockSpec((tn, C, thw), lambda n, j: (n, 0, j)),
            pl.BlockSpec((1, C, 1), lambda n, j: (0, 0, 0)),
            pl.BlockSpec((1, C, 1), lambda n, j: (0, 0, 0)),
        ],
        out_specs=pl.BlockSpec((tn, C, thw), lambda n, j: (n, 0, j)),
        compiler_params=pltpu.CompilerParams(
            dimension_semantics=("parallel", "parallel"),
            vmem_limit_bytes=vmem_limit,
        ),
    )(x3d, w3, b3)


def layer_norm(x, weight, bias, eps=1e-6, data_format="channels_last"):
    """Forward pass of the ConvNeXt LayerNorm module."""
    if data_format == "channels_last":
        C = x.shape[-1]
        y = _layer_norm_rows(x.reshape(-1, C), weight, bias, eps)
        return y.reshape(x.shape)
    elif data_format == "channels_first":
        # x is (N, C, *spatial); normalize over the channel axis without transposes.
        N, C = x.shape[0], x.shape[1]
        hw = 1
        for s in x.shape[2:]:
            hw *= s
        y = _layer_norm_channels_first(x.reshape(N, C, hw), weight, bias, eps)
        return y.reshape(x.shape)
    else:
        raise NotImplementedError


# ---------------------------------------------------------------------------
# Reference + test
# ---------------------------------------------------------------------------
def _reference(x, weight, bias, eps, data_format):
    if data_format == "channels_last":
        u = jnp.mean(x, axis=-1, keepdims=True)
        s = jnp.mean((x - u) ** 2, axis=-1, keepdims=True)
        return (x - u) / jnp.sqrt(s + eps) * weight + bias
    else:
        u = jnp.mean(x, axis=1, keepdims=True)
        s = jnp.mean((x - u) ** 2, axis=1, keepdims=True)
        xn = (x - u) / jnp.sqrt(s + eps)
        return weight[:, None, None] * xn + bias[:, None, None]


if __name__ == "__main__":
    key = jax.random.PRNGKey(0)
    k1, k2, k3, k4 = jax.random.split(key, 4)

    C = 32
    eps = 1e-6
    # Parameters exactly as in the module's __init__ (deterministic).
    weight = jnp.ones((C,), dtype=jnp.float32)
    bias = jnp.zeros((C,), dtype=jnp.float32)

    # channels_first input: NCHW
    x_cf = jax.random.normal(k1, (2, C, 16, 16), dtype=jnp.float32)
    y_cf = layer_norm(x_cf, weight, bias, eps, data_format="channels_first")
    jax.block_until_ready(y_cf)
    ref_cf = _reference(x_cf, weight, bias, eps, "channels_first")
    assert jnp.allclose(y_cf, ref_cf, atol=1e-4, rtol=1e-4)

    # channels_last input: N, H, W, C (C=32 exercises the lane-packed MXU path)
    x_cl = jax.random.normal(k2, (2, 16, 16, C), dtype=jnp.float32)
    y_cl = layer_norm(x_cl, weight, bias, eps, data_format="channels_last")
    jax.block_until_ready(y_cl)
    ref_cl = _reference(x_cl, weight, bias, eps, "channels_last")
    assert jnp.allclose(y_cl, ref_cl, atol=1e-4, rtol=1e-4)

    # Same paths with non-trivial (trained-like) weight/bias to verify the
    # tiled-weight broadcasts in both kernels.
    w_r = jax.random.normal(k3, (C,), dtype=jnp.float32)
    b_r = jax.random.normal(k4, (C,), dtype=jnp.float32)
    y_cf2 = layer_norm(x_cf, w_r, b_r, eps, data_format="channels_first")
    y_cl2 = layer_norm(x_cl, w_r, b_r, eps, data_format="channels_last")
    jax.block_until_ready((y_cf2, y_cl2))
    assert jnp.allclose(y_cf2, _reference(x_cf, w_r, b_r, eps, "channels_first"),
                        atol=1e-4, rtol=1e-4)
    assert jnp.allclose(y_cl2, _reference(x_cl, w_r, b_r, eps, "channels_last"),
                        atol=1e-4, rtol=1e-4)

    print("KERNEL_OK")
</pallas_src>

<mosaic_0001>
module attributes {stable_mosaic.version = 11 : i64} {
  func.func @_layernorm_cf_kernel(%arg0: i32, %arg1: i32, %arg2: memref<2x32x256xf32, #tpu.memory_space<vmem>>, %arg3: memref<1x32x1xf32, #tpu.memory_space<vmem>>, %arg4: memref<1x32x1xf32, #tpu.memory_space<vmem>>, %arg5: memref<2x32x256xf32, #tpu.memory_space<vmem>>) attributes {dimension_semantics = [#tpu.dimension_semantics<parallel>, #tpu.dimension_semantics<parallel>], iteration_bounds = array<i64: 1, 1>, scalar_prefetch = 0 : i64, scratch_operands = 0 : i64, tpu.core_type = #tpu.core_type<tc>, window_params = [{transform_indices = @transform_0, window_bounds = array<i64: 2, 32, 256>}, {pipeline_mode = #tpu.pipeline_mode<synchronous>, transform_indices = @transform_1, window_bounds = array<i64: 1, 32, 1>}, {pipeline_mode = #tpu.pipeline_mode<synchronous>, transform_indices = @transform_2, window_bounds = array<i64: 1, 32, 1>}, {transform_indices = @transform_3, window_bounds = array<i64: 2, 32, 256>}]} {
    %c0 = arith.constant 0 : index
    %c0_0 = arith.constant 0 : index
    %c0_1 = arith.constant 0 : index
    %0 = vector.load %arg2[%c0, %c0_0, %c0_1] : memref<2x32x256xf32, #tpu.memory_space<vmem>>, vector<2x32x256xf32>
    %cst = arith.constant dense<0.000000e+00> : vector<2x256xf32>
    %1 = vector.multi_reduction <add>, %0, %cst [1] : vector<2x32x256xf32> to vector<2x256xf32>
    %2 = vector.shape_cast %1 : vector<2x256xf32> to vector<2x1x256xf32>
    %cst_2 = arith.constant 3.125000e-02 : f32
    %3 = vector.broadcast %cst_2 : f32 to vector<2x1x256xf32>
    %4 = arith.mulf %2, %3 : vector<2x1x256xf32>
    %5 = vector.broadcast %4 : vector<2x1x256xf32> to vector<2x32x256xf32>
    %6 = arith.subf %0, %5 : vector<2x32x256xf32>
    %7 = arith.mulf %6, %6 : vector<2x32x256xf32>
    %cst_3 = arith.constant dense<0.000000e+00> : vector<2x256xf32>
    %8 = vector.multi_reduction <add>, %7, %cst_3 [1] : vector<2x32x256xf32> to vector<2x256xf32>
    %9 = vector.shape_cast %8 : vector<2x256xf32> to vector<2x1x256xf32>
    %cst_4 = arith.constant 3.125000e-02 : f32
    %10 = vector.broadcast %cst_4 : f32 to vector<2x1x256xf32>
    %11 = arith.mulf %9, %10 : vector<2x1x256xf32>
    %cst_5 = arith.constant 9.99999997E-7 : f32
    %12 = vector.broadcast %cst_5 : f32 to vector<2x1x256xf32>
    %13 = arith.addf %11, %12 : vector<2x1x256xf32>
    %14 = math.rsqrt %13 : vector<2x1x256xf32>
    %c0_6 = arith.constant 0 : index
    %c0_7 = arith.constant 0 : index
    %c0_8 = arith.constant 0 : index
    %15 = vector.load %arg3[%c0_6, %c0_7, %c0_8] : memref<1x32x1xf32, #tpu.memory_space<vmem>>, vector<1x32x1xf32>
    %c0_9 = arith.constant 0 : index
    %c0_10 = arith.constant 0 : index
    %c0_11 = arith.constant 0 : index
    %16 = vector.load %arg4[%c0_9, %c0_10, %c0_11] : memref<1x32x1xf32, #tpu.memory_space<vmem>>, vector<1x32x1xf32>
    %17 = vector.broadcast %14 : vector<2x1x256xf32> to vector<2x32x256xf32>
    %18 = arith.mulf %6, %17 : vector<2x32x256xf32>
    %19 = vector.broadcast %15 : vector<1x32x1xf32> to vector<2x32x256xf32>
    %20 = arith.mulf %18, %19 : vector<2x32x256xf32>
    %21 = vector.broadcast %16 : vector<1x32x1xf32> to vector<2x32x256xf32>
    %22 = arith.addf %20, %21 : vector<2x32x256xf32>
    %c0_12 = arith.constant 0 : index
    %c0_13 = arith.constant 0 : index
    %c0_14 = arith.constant 0 : index
    %23 = vector.load %arg5[%c0_12, %c0_13, %c0_14] : memref<2x32x256xf32, #tpu.memory_space<vmem>>, vector<2x32x256xf32>
    tpu.vector_store %arg5[%c0_12, %c0_13, %c0_14], %22 {strides = array<i32>} : memref<2x32x256xf32, #tpu.memory_space<vmem>>, vector<2x32x256xf32>,
    return
  }
  func.func @transform_0(%arg0: i32, %arg1: i32) -> (i32, i32, i32) {
    %c0_i32 = arith.constant 0 : i32
    %c0_i32_0 = arith.constant 0 : i32
    return %arg0, %c0_i32, %arg1 : i32, i32, i32
  }
  func.func @transform_1(%arg0: i32, %arg1: i32) -> (i32, i32, i32) {
    %c0_i32 = arith.constant 0 : i32
    %c0_i32_0 = arith.constant 0 : i32
    %c0_i32_1 = arith.constant 0 : i32
    %c0_i32_2 = arith.constant 0 : i32
    return %c0_i32, %c0_i32_0, %c0_i32_1 : i32, i32, i32
  }
  func.func @transform_2(%arg0: i32, %arg1: i32) -> (i32, i32, i32) {
    %c0_i32 = arith.constant 0 : i32
    %c0_i32_0 = arith.constant 0 : i32
    %c0_i32_1 = arith.constant 0 : i32
    %c0_i32_2 = arith.constant 0 : i32
    return %c0_i32, %c0_i32_0, %c0_i32_1 : i32, i32, i32
  }
  func.func @transform_3(%arg0: i32, %arg1: i32) -> (i32, i32, i32) {
    %c0_i32 = arith.constant 0 : i32
    %c0_i32_0 = arith.constant 0 : i32
    return %arg0, %c0_i32, %arg1 : i32, i32, i32
  }
}

</mosaic_0001>

<bundles_post_ra>
// kernel: tpu_custom_call.1
= control target key start
LH: loop header
LB: loop body
LE: loop exit
PB: predicated region body
PF: predicated region fallthrough
CT: control target
= control target key end

     0   :  { %8 = vsyncpa [#allocation3], 0  ;;  %s494_s0 = inlined_call_operand.hbm [shape: f32[2,32,256], index: 0, kind: input, shape index: {}]   ;;  %s495_s1 = inlined_call_operand.vmem [shape: f32[1,32,1], index: 1, kind: input, shape index: {}]   ;;  %s496_s2 = inlined_call_operand.vmem [shape: f32[1,32,1], index: 2, kind: input, shape index: {}]   ;;  %s497_s3 = inlined_call_operand.hbm [shape: f32[2,32,256], index: 3, kind: output, shape index: {}]  }
   0x1   :  { %9 = vsyncpa [#allocation4], 0  ;;  %s353_s12 = smov [#allocation2]  }
   0x2   :  { %s15_s13 = sshll.u32 %s353_s12, 4  ;;  %s16_s13 = int_to_ptr.vmem [resolvable:$true] %s15_s13 }
   0x3   :  { %s317_s14 = scalar_lea.vmem %s16_s13, 2048  ;;  %p322_p1 = scmp.lt.s32.totalorder %s16_s13, %s16_s13 }
   0x4   :  { %p318_p0 = scmp.ne.s32.totalorder %s16_s13, %s317_s14  ;;  %p323_p2 = scmp.lt.s32.totalorder %s317_s14, %s317_s14 }
   0x6   :  { %p324_p3 = por %p323_p2, %p322_p1 }
   0x8   :  { %p325_p4 = pnand %p324_p3, %p318_p0 }
   0xa   :  { %328 = shalt.err (!%p325_p4)
}
   0xb   :  { %s354_s15 = smov 256   ;;  %s355_s16 = smov 16  }
   0xc   :  { %21 = dma.hbm_to_vmem [thread:$0]  %s494_s0, 2048, %s16_s13, [#allocation3], %s354_s15, %s354_s15, %s355_s16  }
   0xd   :  { %349 = dma.done.wait [#allocation3], 2048  }
   0xe   :  { %350 = vsyncadd [#allocation3], 4294965248  ;;  %v356_v0 = vmov 0   ;;  %v167_v1 = vld [vmem:[%s495_s1 + $0x10] sm:$0xff]  ;;  %v165_v2 = vld [vmem:[%s495_s1] sm:$0xff] }
   0xf   :  { %300 = vset.pattern.permute.xlu1 %v356_v0  ;;  %299 = vset.pattern.permute.xlu0 %v356_v0  ;;  %v168_v3 = vld [vmem:[%s495_s1 + $0x18] sm:$0xff]  ;;  %v166_v4 = vld [vmem:[%s495_s1 + $0x8] sm:$0xff]  ;;  %v169_v6 = vld [vmem:[%s496_s2] sm:$0xff]  ;;  %s357_s1 = smov [#allocation5]  }
  0x10   :  { %201 = vperm.xlu1 %300, %v167_v1   ;;  %191 = vperm.xlu0 %299, %v165_v2   ;;  %v170_v5 = vld [vmem:[%s496_s2 + $0x8] sm:$0xff]  ;;  %v172_v7 = vld [vmem:[%s496_s2 + $0x18] sm:$0xff]  ;;  %v171_v8 = vld [vmem:[%s496_s2 + $0x10] sm:$0xff]  ;;  %s282_s2 = sshll.u32 %s357_s1, 4  ;;  %s283_s2 = int_to_ptr.vmem [resolvable:$true] %s282_s2 }
  0x11   :  { %v29_v9 = vld [vmem:[#allocation2] sm:$0xff]  ;;  %v31_v10 = vld [vmem:[#allocation2 + $0x10] sm:$0xff]  ;;  %v30_v11 = vld [vmem:[#allocation2 + $0x8] sm:$0xff]  ;;  %s329_s7 = scalar_lea.vmem %s283_s2, 2048  ;;  %p334_p6 = scmp.lt.s32.totalorder %s283_s2, %s283_s2 }
  0x12   :  { %v32_v12 = vld [vmem:[#allocation2 + $0x18] sm:$0xff]  ;;  %v37_v13 = vld [vmem:[#allocation2 + $0x40] sm:$0xff]  ;;  %v39_v14 = vld [vmem:[#allocation2 + $0x50] sm:$0xff]  ;;  %v45_v17 = vadd.f32 %v31_v10, %v29_v9  ;;  %p330_p5 = scmp.ne.s32.totalorder %s283_s2, %s329_s7  ;;  %p335_p7 = scmp.lt.s32.totalorder %s329_s7, %s329_s7 }
  0x13   :  { %v38_v15 = vld [vmem:[#allocation2 + $0x48] sm:$0xff]  ;;  %v40_v16 = vld [vmem:[#allocation2 + $0x58] sm:$0xff]  ;;  %v33_v18 = vld [vmem:[#allocation2 + $0x20] sm:$0xff]  ;;  %v54_v19 = vadd.f32 %v32_v12, %v30_v11  ;;  %v63_v21 = vadd.f32 %v39_v14, %v37_v13 }
  0x14   :  { %206 = vperm.xlu1 %300, %v168_v3   ;;  %196 = vperm.xlu0 %299, %v166_v4   ;;  %v34_v20 = vld [vmem:[#allocation2 + $0x28] sm:$0xff]  ;;  %v41_v22 = vld [vmem:[#allocation2 + $0x60] sm:$0xff]  ;;  %v72_v23 = vadd.f32 %v40_v16, %v38_v15  ;;  %v46_v25 = vadd.f32 %v45_v17, %v33_v18  ;;  %v35_v26 = vld [vmem:[#allocation2 + $0x30] sm:$0xff]  ;;  %p336_p8 = por %p335_p7, %p334_p6 }
  0x15   :  { %v42_v24 = vld [vmem:[#allocation2 + $0x68] sm:$0xff]  ;;  %v55_v27 = vadd.f32 %v54_v19, %v34_v20  ;;  %v36_v28 = vld [vmem:[#allocation2 + $0x38] sm:$0xff]  ;;  %v64_v29 = vadd.f32 %v63_v21, %v41_v22  ;;  %v43_v30 = vld [vmem:[#allocation2 + $0x70] sm:$0xff] }
  0x16   :  { %v73_v31 = vadd.f32 %v72_v23, %v42_v24  ;;  %v44_v32 = vld [vmem:[#allocation2 + $0x78] sm:$0xff]  ;;  %v47_v33 = vadd.f32 %v46_v25, %v35_v26  ;;  %p337_p9 = pnand %p336_p8, %p330_p5 }
  0x17   :  { %v56_v34 = vadd.f32 %v55_v27, %v36_v28  ;;  %v65_v35 = vadd.f32 %v64_v29, %v43_v30 }
  0x18   :  { %232 = vperm.xlu1 %300, %v170_v5   ;;  %227 = vperm.xlu0 %299, %v169_v6   ;;  %v74_v36 = vadd.f32 %v73_v31, %v44_v32  ;;  %v48_v37 = vrot.slane %v47_v33, 4 }
  0x19   :  { %v57_v38 = vrot.slane %v56_v34, 4  ;;  %v66_v39 = vrot.slane %v65_v35, 4 }
  0x1a   :  { %v75_v40 = vrot.slane %v74_v36, 4  ;;  %v49_v41 = vadd.f32 %v48_v37, %v47_v33 }
  0x1b   :  { %v58_v42 = vadd.f32 %v57_v38, %v56_v34  ;;  %v67_v43 = vadd.f32 %v66_v39, %v65_v35 }
  0x1c   :  { %242 = vperm.xlu1 %300, %v172_v7   ;;  %237 = vperm.xlu0 %299, %v171_v8   ;;  %v76_v44 = vadd.f32 %v75_v40, %v74_v36  ;;  %v50_v45 = vrot.slane %v49_v41, 2 }
  0x1d   :  { %v59_v46 = vrot.slane %v58_v42, 2  ;;  %v68_v47 = vrot.slane %v67_v43, 2 }
  0x1e   :  { %v77_v48 = vrot.slane %v76_v44, 2  ;;  %v51_v49 = vadd.f32 %v50_v45, %v49_v41 }
  0x1f   :  { %v60_v50 = vadd.f32 %v59_v46, %v58_v42  ;;  %v69_v51 = vadd.f32 %v68_v47, %v67_v43 }
  0x20   :  { %v78_v52 = vadd.f32 %v77_v48, %v76_v44  ;;  %v52_v53 = vrot.slane %v51_v49, 1 }
  0x21   :  { %v61_v54 = vrot.slane %v60_v50, 1  ;;  %v70_v55 = vrot.slane %v69_v51, 1 }
  0x22   :  { %v79_v56 = vrot.slane %v78_v52, 1  ;;  %v53_v57 = vadd.f32 %v52_v53, %v51_v49 }
  0x23   :  { %v62_v58 = vadd.f32 %v61_v54, %v60_v50  ;;  %v71_v59 = vadd.f32 %v70_v55, %v69_v51 }
  0x24   :  { %v80_v60 = vadd.f32 %v79_v56, %v78_v52  ;;  %v81_v61 = vmul.f32 0.03125, %v53_v57 }
  0x25   :  { %v82_v62 = vmul.f32 0.03125, %v62_v58  ;;  %v83_v63 = vmul.f32 0.03125, %v71_v59 }
  0x26   :  { %v84_v0 = vmul.f32 0.03125, %v80_v60  ;;  %v408_v1 = vsub.f32 %v29_v9, %v81_v61  ;;  %v410_v2 = vsub.f32 %v31_v10, %v81_v61  ;;  %v424_v17 = vsub.f32 %v33_v18, %v81_v61 }
  0x27   :  { %v412_v3 = vsub.f32 %v30_v11, %v82_v62  ;;  %v414_v4 = vsub.f32 %v32_v12, %v82_v62  ;;  %v416_v5 = vsub.f32 %v37_v13, %v83_v63  ;;  %v418_v6 = vsub.f32 %v39_v14, %v83_v63 }
  0x28   :  { %v420_v7 = vsub.f32 %v38_v15, %v84_v0  ;;  %v422_v8 = vsub.f32 %v40_v16, %v84_v0  ;;  %v101_v9 = vmul.f32 %v408_v1, %v408_v1  ;;  %v103_v10 = vmul.f32 %v410_v2, %v410_v2 }
  0x29   :  { %v430_v11 = vsub.f32 %v34_v20, %v82_v62  ;;  %v102_v12 = vmul.f32 %v412_v3, %v412_v3  ;;  %v104_v13 = vmul.f32 %v414_v4, %v414_v4  ;;  %v436_v14 = vsub.f32 %v41_v22, %v83_v63 }
  0x2a   :  { %v109_v15 = vmul.f32 %v416_v5, %v416_v5  ;;  %v111_v16 = vmul.f32 %v418_v6, %v418_v6  ;;  %v442_v18 = vsub.f32 %v42_v24, %v84_v0  ;;  %v110_v19 = vmul.f32 %v420_v7, %v420_v7 }
  0x2b   :  { %v112_v20 = vmul.f32 %v422_v8, %v422_v8  ;;  %v448_v21 = vsub.f32 %v35_v26, %v81_v61  ;;  %v105_v22 = vmul.f32 %v424_v17, %v424_v17  ;;  %v117_v23 = vadd.f32 %v103_v10, %v101_v9 }
  0x2c   :  { %v452_v25 = vsub.f32 %v36_v28, %v82_v62  ;;  %v106_v27 = vmul.f32 %v430_v11, %v430_v11  ;;  %v126_v29 = vadd.f32 %v104_v13, %v102_v12  ;;  %v456_v24 = vsub.f32 %v43_v30, %v83_v63 }
  0x2d   :  { %v113_v31 = vmul.f32 %v436_v14, %v436_v14  ;;  %v135_v33 = vadd.f32 %v111_v16, %v109_v15  ;;  %v460_v34 = vsub.f32 %v44_v32, %v84_v0  ;;  %v114_v26 = vmul.f32 %v442_v18, %v442_v18 }
  0x2e   :  { %v144_v35 = vadd.f32 %v112_v20, %v110_v19  ;;  %v107_v28 = vmul.f32 %v448_v21, %v448_v21  ;;  %v118_v36 = vadd.f32 %v117_v23, %v105_v22  ;;  %v108_v37 = vmul.f32 %v452_v25, %v452_v25 }
  0x2f   :  { %v127_v38 = vadd.f32 %v126_v29, %v106_v27  ;;  %v115_v30 = vmul.f32 %v456_v24, %v456_v24  ;;  %v136_v39 = vadd.f32 %v135_v33, %v113_v31  ;;  %v116_v32 = vmul.f32 %v460_v34, %v460_v34 }
  0x30   :  { %v145_v40 = vadd.f32 %v144_v35, %v114_v26  ;;  %v119_v41 = vadd.f32 %v118_v36, %v107_v28 }
  0x31   :  { %v128_v42 = vadd.f32 %v127_v38, %v108_v37  ;;  %v137_v43 = vadd.f32 %v136_v39, %v115_v30 }
  0x32   :  { %v146_v44 = vadd.f32 %v145_v40, %v116_v32  ;;  %v120_v45 = vrot.slane %v119_v41, 4 }
  0x33   :  { %v129_v46 = vrot.slane %v128_v42, 4  ;;  %v138_v47 = vrot.slane %v137_v43, 4 }
  0x34   :  { %v147_v48 = vrot.slane %v146_v44, 4  ;;  %v121_v49 = vadd.f32 %v120_v45, %v119_v41 }
  0x35   :  { %v130_v50 = vadd.f32 %v129_v46, %v128_v42  ;;  %v139_v51 = vadd.f32 %v138_v47, %v137_v43 }
  0x36   :  { %v148_v52 = vadd.f32 %v147_v48, %v146_v44  ;;  %v122_v53 = vrot.slane %v121_v49, 2 }
  0x37   :  { %v131_v54 = vrot.slane %v130_v50, 2  ;;  %v140_v55 = vrot.slane %v139_v51, 2 }
  0x38   :  { %v149_v56 = vrot.slane %v148_v52, 2  ;;  %v123_v57 = vadd.f32 %v122_v53, %v121_v49 }
  0x39   :  { %v132_v58 = vadd.f32 %v131_v54, %v130_v50  ;;  %v141_v59 = vadd.f32 %v140_v55, %v139_v51 }
  0x3a   :  { %v150_v60 = vadd.f32 %v149_v56, %v148_v52  ;;  %v124_v61 = vrot.slane %v123_v57, 1 }
  0x3b   :  { %v133_v62 = vrot.slane %v132_v58, 1  ;;  %v142_v63 = vrot.slane %v141_v59, 1 }
  0x3c   :  { %v151_v0 = vrot.slane %v150_v60, 1  ;;  %v125_v9 = vadd.f32 %v124_v61, %v123_v57 }
  0x3d   :  { %v134_v10 = vadd.f32 %v133_v62, %v132_v58  ;;  %v143_v12 = vadd.f32 %v142_v63, %v141_v59 }
  0x3e   :  { %v152_v13 = vadd.f32 %v151_v0, %v150_v60  ;;  %v153_v15 = vmul.f32 0.03125, %v125_v9 }
  0x3f   :  { %v154_v16 = vmul.f32 0.03125, %v134_v10  ;;  %v155_v19 = vmul.f32 0.03125, %v143_v12 }
  0x40   :  { %v156_v20 = vmul.f32 0.03125, %v152_v13  ;;  %v157_v22 = vadd.f32 1e-06, %v153_v15 }
  0x41   :  { %v158_v23 = vadd.f32 1e-06, %v154_v16  ;;  %v159_v27 = vadd.f32 1e-06, %v155_v19 }
  0x42   :  { %v160_v29 = vadd.f32 1e-06, %v156_v20  ;;  %301 = vrsqrt.f32 %v157_v22 }
  0x43   :  { %303 = vrsqrt.f32 %v158_v23 }
  0x44   :  { %305 = vrsqrt.f32 %v159_v27 }
  0x45   :  { %307 = vrsqrt.f32 %v160_v29 }
  0x4f   :  { %v302_v31 = vpop.eup %301 }
  0x50   :  { %v304_v33 = vpop.eup %303  ;;  %v175_v37 = vmul.f32 %v302_v31, %v410_v2  ;;  %v173_v32 = vmul.f32 %v302_v31, %v408_v1  ;;  %v179_v45 = vmul.f32 %v302_v31, %v448_v21 }
  0x51   :  { %v306_v26 = vpop.eup %305  ;;  %v176_v38 = vmul.f32 %v304_v33, %v414_v4  ;;  %v174_v40 = vmul.f32 %v304_v33, %v412_v3  ;;  %v180_v2 = vmul.f32 %v304_v33, %v452_v25  ;;  %v177_v4 = vmul.f32 %v302_v31, %v424_v17 }
  0x52   :  { %v308_v36 = vpop.eup %307  ;;  %v183_v30 = vmul.f32 %v306_v26, %v418_v6  ;;  %v181_v41 = vmul.f32 %v306_v26, %v416_v5  ;;  %v178_v6 = vmul.f32 %v304_v33, %v430_v11  ;;  %v185_v3 = vmul.f32 %v306_v26, %v436_v14 }
  0x53   :  { %v184_v39 = vmul.f32 %v308_v36, %v422_v8  ;;  %v182_v42 = vmul.f32 %v308_v36, %v420_v7  ;;  %v187_v8 = vmul.f32 %v306_v26, %v456_v24  ;;  %v188_v1 = vmul.f32 %v308_v36, %v460_v34 }
  0x54   :  { %v186_v5 = vmul.f32 %v308_v36, %v442_v18 }
  0x8b   :  { %v202_v35 = vpop.permute.xlu1 %201  ;;  %v192_v28 = vpop.permute.xlu0 %191 }
  0x8c   :  { %v209_v49 = vmul.f32 %v192_v28, %v173_v32  ;;  %v210_v21 = vmul.f32 %v192_v28, %v174_v40  ;;  %v217_v50 = vmul.f32 %v192_v28, %v181_v41  ;;  %v218_v25 = vmul.f32 %v192_v28, %v182_v42 }
  0x8d   :  { %v213_v61 = vmul.f32 %v202_v35, %v177_v4  ;;  %v214_v62 = vmul.f32 %v202_v35, %v178_v6  ;;  %v221_v63 = vmul.f32 %v202_v35, %v185_v3  ;;  %v222_v0 = vmul.f32 %v202_v35, %v186_v5 }
  0x8f   :  { %v207_v43 = vpop.permute.xlu1 %206  ;;  %v197_v44 = vpop.permute.xlu0 %196 }
  0x90   :  { %v211_v46 = vmul.f32 %v197_v44, %v175_v37  ;;  %v212_v7 = vmul.f32 %v197_v44, %v176_v38  ;;  %v219_v47 = vmul.f32 %v197_v44, %v183_v30  ;;  %v220_v48 = vmul.f32 %v197_v44, %v184_v39 }
  0x91   :  { %v215_v18 = vmul.f32 %v207_v43, %v179_v45  ;;  %v216_v56 = vmul.f32 %v207_v43, %v180_v2  ;;  %v223_v57 = vmul.f32 %v207_v43, %v187_v8  ;;  %v224_v58 = vmul.f32 %v207_v43, %v188_v1 }
  0x93   :  { %v233_v51 = vpop.permute.xlu1 %232  ;;  %v228_v17 = vpop.permute.xlu0 %227 }
  0x94   :  { %v247_v52 = vadd.f32 %v233_v51, %v211_v46  ;;  %v248_v11 = vadd.f32 %v233_v51, %v212_v7  ;;  %v255_v53 = vadd.f32 %v233_v51, %v219_v47  ;;  %v256_v24 = vadd.f32 %v233_v51, %v220_v48 }
  0x95   :  { %v245_v54 = vadd.f32 %v228_v17, %v209_v49  ;;  %v246_v34 = vadd.f32 %v228_v17, %v210_v21  ;;  %v253_v55 = vadd.f32 %v228_v17, %v217_v50  ;;  %v254_v14 = vadd.f32 %v228_v17, %v218_v25 }
  0x96   :  { %263 = vst [vmem:[#allocation5 + $0x10] sm:$0xff] %v247_v52  ;;  %264 = vst [vmem:[#allocation5 + $0x18] sm:$0xff] %v248_v11 }
  0x97   :  { %271 = vst [vmem:[#allocation5 + $0x50] sm:$0xff] %v255_v53  ;;  %272 = vst [vmem:[#allocation5 + $0x58] sm:$0xff] %v256_v24  ;;  %v243_v59 = vpop.permute.xlu1 %242  ;;  %v238_v60 = vpop.permute.xlu0 %237 }
  0x98   :  { %261 = vst [vmem:[#allocation5] sm:$0xff] %v245_v54  ;;  %262 = vst [vmem:[#allocation5 + $0x8] sm:$0xff] %v246_v34  ;;  %v251_v9 = vadd.f32 %v243_v59, %v215_v18  ;;  %v252_v10 = vadd.f32 %v243_v59, %v216_v56  ;;  %v259_v12 = vadd.f32 %v243_v59, %v223_v57 }
  0x99   :  { %269 = vst [vmem:[#allocation5 + $0x40] sm:$0xff] %v253_v55  ;;  %270 = vst [vmem:[#allocation5 + $0x48] sm:$0xff] %v254_v14  ;;  %v260_v13 = vadd.f32 %v243_v59, %v224_v58  ;;  %v249_v15 = vadd.f32 %v238_v60, %v213_v61  ;;  %v250_v16 = vadd.f32 %v238_v60, %v214_v62 }
  0x9a   :  { %v257_v19 = vadd.f32 %v238_v60, %v221_v63  ;;  %v258_v20 = vadd.f32 %v238_v60, %v222_v0  ;;  %267 = vst [vmem:[#allocation5 + $0x30] sm:$0xff] %v251_v9  ;;  %268 = vst [vmem:[#allocation5 + $0x38] sm:$0xff] %v252_v10 }
  0x9b   :  { %275 = vst [vmem:[#allocation5 + $0x70] sm:$0xff] %v259_v12  ;;  %276 = vst [vmem:[#allocation5 + $0x78] sm:$0xff] %v260_v13 }
  0x9c   :  { %265 = vst [vmem:[#allocation5 + $0x20] sm:$0xff] %v249_v15  ;;  %266 = vst [vmem:[#allocation5 + $0x28] sm:$0xff] %v250_v16 }
  0x9d   :  { %273 = vst [vmem:[#allocation5 + $0x60] sm:$0xff] %v257_v19  ;;  %274 = vst [vmem:[#allocation5 + $0x68] sm:$0xff] %v258_v20 }
  0x9e   :  { %340 = shalt.err (!%p337_p9)
}
  0x9f   :  { %288 = dma.vmem_to_hbm [thread:$0]  %s283_s2, 2048, %s497_s3, [#allocation4], %s354_s15, %s354_s15, %s355_s16  }
  0xa0   :  { %351 = dma.done.wait [#allocation4], 2048  }
  0xa1   :  { %352 = vsyncadd [#allocation4], 4294965248 }
  0xa2   :  { %292 = vsyncpa [#allocation3], 1 }
  0xa3   :  { %293 = vsyncpa [#allocation4], 1 }

</bundles_post_ra>
